<compile_context>
chip_gen: v7x
topology: tpu7x:2x2x1
jax: 0.10.0
libtpu: 0.0.40
codegen_flags: <defaults>
</compile_context>

<pallas_src>
import jax
import jax.numpy as jnp
from jax.experimental import pallas as pl
from jax.experimental.pallas import tpu as pltpu

LANE = 128
SUBLANE = 8


def _round_up(x, m):
    return ((x + m - 1) // m) * m


def _pad2(a, r, c):
    return jnp.pad(a, ((0, r - a.shape[0]), (0, c - a.shape[1])))


def _vmem_capacity_bytes():
    """Per-core VMEM capacity; conservative (v7x) fallback if query fails."""
    try:
        info = pltpu.get_tpu_info()
        cap = getattr(info, "vmem_capacity_bytes", None)
        if cap:
            return int(cap)
    except Exception:
        pass
    return 64 << 20


def _make_encoder_kernel(n_hidden, l_pad):
    """Kernel for an MLP with `n_hidden` (Linear+ReLU) layers + fused mu/log_var head."""

    def kernel(*refs):
        # inputs : x, (w_i, b_i) * n_hidden, w_head, b_head, eps
        # outputs: z, head (= [mu | log_var])
        x_ref = refs[0]
        hidden_refs = refs[1:1 + 2 * n_hidden]
        wh_ref = refs[1 + 2 * n_hidden]
        bh_ref = refs[2 + 2 * n_hidden]
        eps_ref = refs[3 + 2 * n_hidden]
        z_ref = refs[4 + 2 * n_hidden]
        head_ref = refs[5 + 2 * n_hidden]

        h = x_ref[...]                                   # f32 or bf16 activations
        for i in range(n_hidden):
            w = hidden_refs[2 * i][...]                  # f32 or bf16 weights
            b = hidden_refs[2 * i + 1][...]              # f32 bias
            h = jnp.dot(h.astype(w.dtype), w,
                        preferred_element_type=jnp.float32) + b
            h = jnp.maximum(h, 0.0)                      # ReLU (VPU, f32)

        wh = wh_ref[...]
        head = jnp.dot(h.astype(wh.dtype), wh,
                       preferred_element_type=jnp.float32) + bh_ref[...]

        mu = head[:, :l_pad]
        log_var = head[:, l_pad:]
        std = jnp.exp(log_var * 0.5)                     # EUP, f32
        z = mu + std * eps_ref[...]

        head_ref[...] = head                             # one wide lane-dense store
        z_ref[...] = z

    return kernel


def prepare_encoder_params(params, *, use_bf16=False):
    """Pad, cast and fuse parameters ONCE (hoisted out of the forward path).

    params: dict with keys
      'hidden': list of (W_i (in,out), b_i (1,out)) tuples
      'mu':     (W (in,out), b (1,out))
      'log_var':(W (in,out), b (1,out))
    bf16 weights are valid on v5e / v6e / v7x (bf16-native MXUs); accumulation
    stays f32 in the kernel.
    """
    n_hidden = len(params["hidden"])
    input_dim = params["hidden"][0][0].shape[0]
    hidden_dims = [w.shape[1] for (w, _) in params["hidden"]]
    latent_dim = params["mu"][0].shape[1]

    d_pads = [_round_up(d, LANE) for d in [input_dim, *hidden_dims]]
    l_pad = _round_up(latent_dim, LANE)
    wdt = jnp.bfloat16 if use_bf16 else jnp.float32

    flat = []  # resident params: (w0, b0, ..., w_head, b_head)
    for i, (w, b) in enumerate(params["hidden"]):
        flat.append(_pad2(w, d_pads[i], d_pads[i + 1]).astype(wdt))
        flat.append(_pad2(b, 1, d_pads[i + 1]).astype(jnp.float32))

    wmu, bmu = params["mu"]
    wlv, blv = params["log_var"]
    w_head = jnp.concatenate([_pad2(wmu, d_pads[-1], l_pad),
                              _pad2(wlv, d_pads[-1], l_pad)], axis=1).astype(wdt)
    b_head = jnp.concatenate([_pad2(bmu, 1, l_pad),
                              _pad2(blv, 1, l_pad)], axis=1).astype(jnp.float32)
    flat.extend([w_head, b_head])

    return {
        "flat": tuple(flat),
        "n_hidden": n_hidden,
        "input_dim": input_dim,
        "latent_dim": latent_dim,
        "d_pads": d_pads,
        "l_pad": l_pad,
        "use_bf16": use_bf16,
    }


def _choose_batch_tile(batch, batch_tile, granule, working_set, budget):
    b_al = _round_up(batch, granule)
    tb = min(_round_up(batch_tile, granule), b_al)

    # MXU-friendly rounding for large tiles (keep the 256x256 MXU fed).
    if tb >= 256:
        tb = (tb // 256) * 256
    elif tb >= 128:
        tb = (tb // 128) * 128

    # Guarantee >= 2 grid steps whenever the batch allows so v7x's two
    # TensorCores both get work (harmless extra step on single-TC chips).
    if b_al >= 2 * granule:
        half = _round_up(-(-b_al // 2), granule)
        tb = min(tb, half)

    # Shrink against the VMEM budget; keep a 128-row floor for large batches.
    floor = 128 if (b_al >= 256 and granule <= 128) else granule
    while tb > floor and working_set(tb) > budget:
        tb = max(floor, _round_up(tb // 2, granule))
    return tb


def encoder_forward(x, prepared, eps, *, batch_tile=1024):
    """Run the Encoder forward pass as a single Pallas kernel.

    x:        (batch, input_dim) float32
    prepared: output of prepare_encoder_params()
    eps:      (batch, latent_dim) float32 standard-normal noise
    Returns (z, mu, log_var), each (batch, latent_dim) float32.
    """
    flat = prepared["flat"]
    n_hidden = prepared["n_hidden"]
    d_pads = prepared["d_pads"]
    l_pad = prepared["l_pad"]
    latent_dim = prepared["latent_dim"]
    use_bf16 = prepared["use_bf16"]

    batch, input_dim = x.shape
    assert input_dim == prepared["input_dim"]

    xdt = jnp.bfloat16 if use_bf16 else jnp.float32
    x_itemsize = 2 if use_bf16 else 4
    granule = 16 if use_bf16 else SUBLANE  # bf16 packs 16 rows per sublane tile

    # ---- VMEM-budgeted batch-tile sizing (chip-aware) ----------------------
    vmem_cap = _vmem_capacity_bytes()
    budget = int(0.7 * vmem_cap)

    w_bytes = 2 * sum(int(a.size) * a.dtype.itemsize for a in flat)  # 2x: pipeline
                                                                     # double-buffers
                                                                     # resident specs

    def working_set(tb_):
        streamed = (tb_ * d_pads[0] * x_itemsize          # x tile
                    + tb_ * l_pad * 4                     # eps tile
                    + tb_ * l_pad * 4                     # z tile
                    + tb_ * 2 * l_pad * 4)                # head tile
        inter = tb_ * max(d_pads + [2 * l_pad]) * 4 * 2   # live f32 activations
        return w_bytes + 2 * streamed + inter             # 2x = double buffering

    # TODO(synk): if w_bytes alone exceeds `budget` (large hidden dims on v7x's
    # 64 MiB/TC), tb-shrinking cannot help; stream weight N-blocks via an extra
    # grid axis / pltpu.emit_pipeline instead of keeping them resident.

    tb = _choose_batch_tile(batch, batch_tile, granule, working_set, budget)
    b_pad = _round_up(max(batch, tb), tb)

    # ---- pad activations only when actually needed --------------------------
    x_p = x.astype(xdt)
    if x.shape != (b_pad, d_pads[0]):
        x_p = jnp.pad(x_p, ((0, b_pad - batch), (0, d_pads[0] - input_dim)))
    eps_p = eps.astype(jnp.float32)
    if eps.shape != (b_pad, l_pad):
        eps_p = jnp.pad(eps_p, ((0, b_pad - batch), (0, l_pad - latent_dim)))

    # ---- specs ---------------------------------------------------------------
    grid = (b_pad // tb,)

    def resident(shape):
        return pl.BlockSpec(shape, lambda i: (0, 0))

    in_specs = [pl.BlockSpec((tb, d_pads[0]), lambda i: (i, 0))]
    in_specs += [resident(a.shape) for a in flat]
    in_specs += [pl.BlockSpec((tb, l_pad), lambda i: (i, 0))]

    out_specs = (pl.BlockSpec((tb, l_pad), lambda i: (i, 0)),
                 pl.BlockSpec((tb, 2 * l_pad), lambda i: (i, 0)))
    out_shape = (jax.ShapeDtypeStruct((b_pad, l_pad), jnp.float32),
                 jax.ShapeDtypeStruct((b_pad, 2 * l_pad), jnp.float32))

    vmem_limit = int(min(max(int(1.25 * working_set(tb)), 32 << 20),
                         int(0.9 * vmem_cap)))

    z_pad, head_pad = pl.pallas_call(
        _make_encoder_kernel(n_hidden, l_pad),
        out_shape=out_shape,
        grid=grid,
        in_specs=in_specs,
        out_specs=out_specs,
        compiler_params=pltpu.CompilerParams(
            dimension_semantics=("parallel",),
            vmem_limit_bytes=vmem_limit),
    )(x_p, *flat, eps_p)

    z = z_pad[:batch, :latent_dim]
    mu = head_pad[:batch, :latent_dim]
    log_var = head_pad[:batch, l_pad:l_pad + latent_dim]
    return z, mu, log_var


def init_encoder_params(key, input_dim, hidden_dims, latent_dim):
    """Deterministic parameter init mirroring nn.Linear shapes.

    Weights are stored transposed relative to PyTorch: (in_features, out_features).
    """
    neurons = [input_dim, *hidden_dims]
    params = {"hidden": []}
    for i in range(1, len(neurons)):
        key, kw, kb = jax.random.split(key, 3)
        bound = 1.0 / jnp.sqrt(neurons[i - 1])
        w = jax.random.uniform(kw, (neurons[i - 1], neurons[i]),
                               minval=-bound, maxval=bound, dtype=jnp.float32)
        b = jax.random.uniform(kb, (1, neurons[i]),
                               minval=-bound, maxval=bound, dtype=jnp.float32)
        params["hidden"].append((w, b))

    for name in ("mu", "log_var"):
        key, kw, kb = jax.random.split(key, 3)
        bound = 1.0 / jnp.sqrt(hidden_dims[-1])
        w = jax.random.uniform(kw, (hidden_dims[-1], latent_dim),
                               minval=-bound, maxval=bound, dtype=jnp.float32)
        b = jax.random.uniform(kb, (1, latent_dim),
                               minval=-bound, maxval=bound, dtype=jnp.float32)
        params[name] = (w, b)
    return params


def encoder_forward_ref(x, params, eps):
    """Pure-JAX reference for correctness checking."""
    h = x
    for w, b in params["hidden"]:
        h = jnp.maximum(h @ w + b, 0.0)
    mu = h @ params["mu"][0] + params["mu"][1]
    lv = h @ params["log_var"][0] + params["log_var"][1]
    z = mu + jnp.exp(0.5 * lv) * eps
    return z, mu, lv


if __name__ == "__main__":
    # Small shapes consistent with the module: an MLP encoder.
    batch = 24
    input_dim = 32
    hidden_dims = [64, 32]
    latent_dim = 16

    key = jax.random.PRNGKey(0)
    key, kx, keps, kp = jax.random.split(key, 4)

    x = jax.random.normal(kx, (batch, input_dim), dtype=jnp.float32)
    eps = jax.random.normal(keps, (batch, latent_dim), dtype=jnp.float32)
    params = init_encoder_params(kp, input_dim, hidden_dims, latent_dim)

    z_r, mu_r, lv_r = encoder_forward_ref(x, params, eps)

    # f32 path, tiny batch_tile -> exercises the multi-step grid / pipeline path.
    prep_f32 = prepare_encoder_params(params, use_bf16=False)
    z, mu, log_var = encoder_forward(x, prep_f32, eps, batch_tile=8)
    jax.block_until_ready((z, mu, log_var))
    assert jnp.allclose(z, z_r, atol=1e-5, rtol=1e-5)
    assert jnp.allclose(mu, mu_r, atol=1e-5, rtol=1e-5)
    assert jnp.allclose(log_var, lv_r, atol=1e-5, rtol=1e-5)

    # f32 path, automatic tile sizing (>= 2 grid steps for megacore sharding).
    z2, mu2, lv2 = encoder_forward(x, prep_f32, eps)
    jax.block_until_ready((z2, mu2, lv2))
    assert jnp.allclose(z2, z_r, atol=1e-5, rtol=1e-5)
    assert jnp.allclose(mu2, mu_r, atol=1e-5, rtol=1e-5)
    assert jnp.allclose(lv2, lv_r, atol=1e-5, rtol=1e-5)

    # bf16 matmuls + bf16-streamed x (valid on v5e/v6e/v7x); loose tolerance vs f32.
    prep_bf16 = prepare_encoder_params(params, use_bf16=True)
    z_b, mu_b, lv_b = encoder_forward(x, prep_bf16, eps)
    jax.block_until_ready((z_b, mu_b, lv_b))
    assert jnp.allclose(z_b, z_r, atol=5e-2, rtol=5e-2)
    assert jnp.allclose(mu_b, mu_r, atol=5e-2, rtol=5e-2)
    assert jnp.allclose(lv_b, lv_r, atol=5e-2, rtol=5e-2)

    print("KERNEL_OK")
</pallas_src>

<mosaic_0001>
module attributes {stable_mosaic.version = 11 : i64} {
  func.func @kernel(%arg0: i32, %arg1: memref<8x128xf32, #tpu.memory_space<vmem>>, %arg2: memref<128x128xf32, #tpu.memory_space<vmem>>, %arg3: memref<1x128xf32, #tpu.memory_space<vmem>>, %arg4: memref<128x128xf32, #tpu.memory_space<vmem>>, %arg5: memref<1x128xf32, #tpu.memory_space<vmem>>, %arg6: memref<128x256xf32, #tpu.memory_space<vmem>>, %arg7: memref<1x256xf32, #tpu.memory_space<vmem>>, %arg8: memref<8x128xf32, #tpu.memory_space<vmem>>, %arg9: memref<8x128xf32, #tpu.memory_space<vmem>>, %arg10: memref<8x256xf32, #tpu.memory_space<vmem>>) attributes {dimension_semantics = [#tpu.dimension_semantics<parallel>], iteration_bounds = array<i64: 3>, scalar_prefetch = 0 : i64, scratch_operands = 0 : i64, tpu.core_type = #tpu.core_type<tc>, window_params = [{transform_indices = @transform_0, window_bounds = array<i64: 8, 128>}, {pipeline_mode = #tpu.pipeline_mode<synchronous>, transform_indices = @transform_1, window_bounds = array<i64: 128, 128>}, {pipeline_mode = #tpu.pipeline_mode<synchronous>, transform_indices = @transform_2, window_bounds = array<i64: 1, 128>}, {pipeline_mode = #tpu.pipeline_mode<synchronous>, transform_indices = @transform_3, window_bounds = array<i64: 128, 128>}, {pipeline_mode = #tpu.pipeline_mode<synchronous>, transform_indices = @transform_4, window_bounds = array<i64: 1, 128>}, {pipeline_mode = #tpu.pipeline_mode<synchronous>, transform_indices = @transform_5, window_bounds = array<i64: 128, 256>}, {pipeline_mode = #tpu.pipeline_mode<synchronous>, transform_indices = @transform_6, window_bounds = array<i64: 1, 256>}, {transform_indices = @transform_7, window_bounds = array<i64: 8, 128>}, {transform_indices = @transform_8, window_bounds = array<i64: 8, 128>}, {transform_indices = @transform_9, window_bounds = array<i64: 8, 256>}]} {
    %c0 = arith.constant 0 : index
    %c0_0 = arith.constant 0 : index
    %0 = vector.load %arg1[%c0, %c0_0] : memref<8x128xf32, #tpu.memory_space<vmem>>, vector<8x128xf32>
    %c0_1 = arith.constant 0 : index
    %c0_2 = arith.constant 0 : index
    %1 = vector.load %arg2[%c0_1, %c0_2] : memref<128x128xf32, #tpu.memory_space<vmem>>, vector<128x128xf32>
    %c0_3 = arith.constant 0 : index
    %c0_4 = arith.constant 0 : index
    %2 = vector.load %arg3[%c0_3, %c0_4] : memref<1x128xf32, #tpu.memory_space<vmem>>, vector<1x128xf32>
    %cst = arith.constant dense<0.000000e+00> : vector<8x128xf32>
    %3 = tpu.matmul %0, %1, %cst {dimension_numbers = #tpu.dot_dimension_numbers<[1], [0], [0], [1], [0, 0, 1, 1], [], []>} : vector<8x128xf32>, vector<128x128xf32>, vector<8x128xf32> -> vector<8x128xf32>
    %4 = vector.broadcast %2 : vector<1x128xf32> to vector<8x128xf32>
    %5 = arith.addf %3, %4 : vector<8x128xf32>
    %cst_5 = arith.constant 0.000000e+00 : f32
    %6 = vector.broadcast %cst_5 : f32 to vector<8x128xf32>
    %7 = arith.maximumf %5, %6 : vector<8x128xf32>
    %c0_6 = arith.constant 0 : index
    %c0_7 = arith.constant 0 : index
    %8 = vector.load %arg4[%c0_6, %c0_7] : memref<128x128xf32, #tpu.memory_space<vmem>>, vector<128x128xf32>
    %c0_8 = arith.constant 0 : index
    %c0_9 = arith.constant 0 : index
    %9 = vector.load %arg5[%c0_8, %c0_9] : memref<1x128xf32, #tpu.memory_space<vmem>>, vector<1x128xf32>
    %cst_10 = arith.constant dense<0.000000e+00> : vector<8x128xf32>
    %10 = tpu.matmul %7, %8, %cst_10 {dimension_numbers = #tpu.dot_dimension_numbers<[1], [0], [0], [1], [0, 0, 1, 1], [], []>} : vector<8x128xf32>, vector<128x128xf32>, vector<8x128xf32> -> vector<8x128xf32>
    %11 = vector.broadcast %9 : vector<1x128xf32> to vector<8x128xf32>
    %12 = arith.addf %10, %11 : vector<8x128xf32>
    %cst_11 = arith.constant 0.000000e+00 : f32
    %13 = vector.broadcast %cst_11 : f32 to vector<8x128xf32>
    %14 = arith.maximumf %12, %13 : vector<8x128xf32>
    %c0_12 = arith.constant 0 : index
    %c0_13 = arith.constant 0 : index
    %15 = vector.load %arg6[%c0_12, %c0_13] : memref<128x256xf32, #tpu.memory_space<vmem>>, vector<128x256xf32>
    %cst_14 = arith.constant dense<0.000000e+00> : vector<8x256xf32>
    %16 = tpu.matmul %14, %15, %cst_14 {dimension_numbers = #tpu.dot_dimension_numbers<[1], [0], [0], [1], [0, 0, 1, 1], [], []>} : vector<8x128xf32>, vector<128x256xf32>, vector<8x256xf32> -> vector<8x256xf32>
    %c0_15 = arith.constant 0 : index
    %c0_16 = arith.constant 0 : index
    %17 = vector.load %arg7[%c0_15, %c0_16] : memref<1x256xf32, #tpu.memory_space<vmem>>, vector<1x256xf32>
    %18 = vector.broadcast %17 : vector<1x256xf32> to vector<8x256xf32>
    %19 = arith.addf %16, %18 : vector<8x256xf32>
    %20 = vector.extract_strided_slice %19 {offsets = [0, 0], sizes = [8, 128], strides = [1, 1]} : vector<8x256xf32> to vector<8x128xf32>
    %21 = vector.extract_strided_slice %19 {offsets = [0, 128], sizes = [8, 128], strides = [1, 1]} : vector<8x256xf32> to vector<8x128xf32>
    %cst_17 = arith.constant 5.000000e-01 : f32
    %22 = vector.broadcast %cst_17 : f32 to vector<8x128xf32>
    %23 = arith.mulf %21, %22 : vector<8x128xf32>
    %24 = math.exp %23 : vector<8x128xf32>
    %c0_18 = arith.constant 0 : index
    %c0_19 = arith.constant 0 : index
    %25 = vector.load %arg8[%c0_18, %c0_19] : memref<8x128xf32, #tpu.memory_space<vmem>>, vector<8x128xf32>
    %26 = arith.mulf %24, %25 : vector<8x128xf32>
    %27 = arith.addf %20, %26 : vector<8x128xf32>
    %c0_20 = arith.constant 0 : index
    %c0_21 = arith.constant 0 : index
    %28 = vector.load %arg10[%c0_20, %c0_21] : memref<8x256xf32, #tpu.memory_space<vmem>>, vector<8x256xf32>
    tpu.vector_store %arg10[%c0_20, %c0_21], %19 {strides = array<i32>} : memref<8x256xf32, #tpu.memory_space<vmem>>, vector<8x256xf32>,
    %c0_22 = arith.constant 0 : index
    %c0_23 = arith.constant 0 : index
    %29 = vector.load %arg9[%c0_22, %c0_23] : memref<8x128xf32, #tpu.memory_space<vmem>>, vector<8x128xf32>
    tpu.vector_store %arg9[%c0_22, %c0_23], %27 {strides = array<i32>} : memref<8x128xf32, #tpu.memory_space<vmem>>, vector<8x128xf32>,
    return
  }
  func.func @transform_0(%arg0: i32) -> (i32, i32) {
    %c0_i32 = arith.constant 0 : i32
    %c0_i32_0 = arith.constant 0 : i32
    return %arg0, %c0_i32 : i32, i32
  }
  func.func @transform_1(%arg0: i32) -> (i32, i32) {
    %c0_i32 = arith.constant 0 : i32
    %c0_i32_0 = arith.constant 0 : i32
    %c0_i32_1 = arith.constant 0 : i32
    return %c0_i32, %c0_i32_0 : i32, i32
  }
  func.func @transform_2(%arg0: i32) -> (i32, i32) {
    %c0_i32 = arith.constant 0 : i32
    %c0_i32_0 = arith.constant 0 : i32
    %c0_i32_1 = arith.constant 0 : i32
    return %c0_i32, %c0_i32_0 : i32, i32
  }
  func.func @transform_3(%arg0: i32) -> (i32, i32) {
    %c0_i32 = arith.constant 0 : i32
    %c0_i32_0 = arith.constant 0 : i32
    %c0_i32_1 = arith.constant 0 : i32
    return %c0_i32, %c0_i32_0 : i32, i32
  }
  func.func @transform_4(%arg0: i32) -> (i32, i32) {
    %c0_i32 = arith.constant 0 : i32
    %c0_i32_0 = arith.constant 0 : i32
    %c0_i32_1 = arith.constant 0 : i32
    return %c0_i32, %c0_i32_0 : i32, i32
  }
  func.func @transform_5(%arg0: i32) -> (i32, i32) {
    %c0_i32 = arith.constant 0 : i32
    %c0_i32_0 = arith.constant 0 : i32
    %c0_i32_1 = arith.constant 0 : i32
    return %c0_i32, %c0_i32_0 : i32, i32
  }
  func.func @transform_6(%arg0: i32) -> (i32, i32) {
    %c0_i32 = arith.constant 0 : i32
    %c0_i32_0 = arith.constant 0 : i32
    %c0_i32_1 = arith.constant 0 : i32
    return %c0_i32, %c0_i32_0 : i32, i32
  }
  func.func @transform_7(%arg0: i32) -> (i32, i32) {
    %c0_i32 = arith.constant 0 : i32
    %c0_i32_0 = arith.constant 0 : i32
    return %arg0, %c0_i32 : i32, i32
  }
  func.func @transform_8(%arg0: i32) -> (i32, i32) {
    %c0_i32 = arith.constant 0 : i32
    %c0_i32_0 = arith.constant 0 : i32
    return %arg0, %c0_i32 : i32, i32
  }
  func.func @transform_9(%arg0: i32) -> (i32, i32) {
    %c0_i32 = arith.constant 0 : i32
    %c0_i32_0 = arith.constant 0 : i32
    return %arg0, %c0_i32 : i32, i32
  }
}

</mosaic_0001>

<bundles_post_ra>
// kernel: tpu_custom_call.1
= control target key start
LH: loop header
LB: loop body
LE: loop exit
PB: predicated region body
PF: predicated region fallthrough
CT: control target
= control target key end

     0   :  { %s1987_s0 = inlined_call_operand.hbm [shape: f32[24,128], index: 0, kind: input, shape index: {}]   ;;  %s1988_s1 = inlined_call_operand.hbm [shape: f32[128,128], index: 1, kind: input, shape index: {}]   ;;  %s1989_s2 = inlined_call_operand.hbm [shape: f32[1,128], index: 2, kind: input, shape index: {}]   ;;  %s1990_s3 = inlined_call_operand.hbm [shape: f32[128,128], index: 3, kind: input, shape index: {}]   ;;  %s1991_s4 = inlined_call_operand.hbm [shape: f32[1,128], index: 4, kind: input, shape index: {}]   ;;  %s1992_s5 = inlined_call_operand.hbm [shape: f32[128,256], index: 5, kind: input, shape index: {}]   ;;  %s1993_s6 = inlined_call_operand.vmem [shape: f32[1,256], index: 6, kind: input, shape index: {}]   ;;  %s1994_s7 = inlined_call_operand.vmem [shape: f32[24,128], index: 7, kind: input, shape index: {}]   ;;  %s1995_s8 = inlined_call_operand.hbm [shape: f32[24,128], index: 8, kind: output, shape index: {0}]   ;;  %s1996_s9 = inlined_call_operand.hbm [shape: f32[24,256], index: 9, kind: output, shape index: {1}]  }
   0x1   :  { %2001 = sst [smem:[#allocation22_spill]] %s1987_s0 }
   0x2   :  { %2002 = sst [smem:[#allocation23_spill]] %s1995_s8 }
   0x3   :  { %15 = vsyncpa [#allocation3], 0 }
   0x4   :  { %17 = vsyncpa [#allocation3 + $0x1], 0 }
   0x5   :  { %18 = vsyncpa [#allocation6], 0 }
   0x6   :  { %19 = vsyncpa [#allocation9], 0 }
   0x7   :  { %20 = vsyncpa [#allocation12], 0 }
   0x8   :  { %21 = vsyncpa [#allocation4], 0 }
   0x9   :  { %23 = vsyncpa [#allocation4 + $0x1], 0 }
   0xa   :  { %24 = vsyncpa [#allocation15], 0 }
   0xb   :  { %26 = vsyncpa [#allocation15 + $0x1], 0  ;;  %s1625_s30 = smov 0   ;;  %s1627_s10 = smov 0  }
   0xc   :  { %s1629_s11 = smov 0   ;;  %s1631_s12 = smov 0  }
   0xd LB: > { %s1560_s13 = smov [#allocation5]   ;;  %s1646_s15 = sadd.s32 4294967295, %s1558_s12   ;;  %s1558_s12 = sphi %s1631_s12, %s2025_s12   ;;  %s1554_s11 = sphi %s1629_s11, %s2024_s11   ;;  %s1550_s10 = sphi %s1627_s10, %s2023_s10   ;;  %s1546_s30 = sphi %s1625_s30, %s2022_s30  }
   0xe   : > { %s279_s14 = sshll.u32 %s1560_s13, 4  ;;  %p954_p0 = scmp.ge.s32.totalorder %s1558_s12, 1  ;;  %s1651_s14 = int_to_ptr.vmem [resolvable:$true] %s279_s14 }
   0xf   : > { %p1998_p1 = scmp.eq.s32.totalorder %s1646_s15, 0  ;;  %p267_p2 = scmp.lt.s32.totalorder %s1558_s12, 4 }
  0x10   : > { %s1561_s17 = smov [#allocation8]   ;;  %s1562_s20 = smov [#allocation7]  }
  0x11   : > { %p1653_p3 = pnand %p954_p0, %p267_p2  ;;  %s303_s18 = sshll.u32 %s1561_s17, 4  ;;  %s1665_s18 = int_to_ptr.vmem [resolvable:$true] %s303_s18 }
  0x12   : > { %s293_s21 = sshll.u32 %s1562_s20, 4  ;;  %s1278_s24 = scalar_lea.hbm %s1988_s1, 2048  ;;  %s1667_s21 = int_to_ptr.vmem [resolvable:$true] %s293_s21 }
  0x13   : > { %s2003_s16 = scalar_select %p1653_p3, 1, 0 }
  0x14   : > { %p1193_p4 = pneg %p1653_p3  ;;  %p1279_p6 = scmp.ne.s32.totalorder %s1988_s1, %s1278_s24 }
  0x15   : > { %p1285_p10 = scmp.lt.u32.totalorder %s1278_s24, %s1988_s1 }
  0x16   : > { %p1661_p5 = pnand %p1193_p4, %p1998_p1 }
  0x18   : > { %p1677_p7 = pneg %p1661_p5 }
  0x1a   : > { %p1281_p8 = pnand %p1677_p7, %p1279_p6 }
  0x1c   : > { %p1282_p9 = pneg %p1281_p8 }
  0x1e   : > { %p1287_p11 = pnand %p1285_p10, %p1282_p9 }
  0x20   : > { %1290 = shalt.err (!%p1287_p11)
}
  0x21   : > { %s1291_s13 = scalar_lea.vmem %s1651_s14, 2048  ;;  %p1299_p2 = scmp.lt.s32.totalorder %s1651_s14, %s1651_s14 }
  0x22   : > { %p1292_p12 = scmp.ne.s32.totalorder %s1651_s14, %s1291_s13  ;;  %p1300_p4 = scmp.lt.s32.totalorder %s1291_s13, %s1291_s13 }
  0x24   : > { %p1294_p13 = pnand %p1292_p12, %p1677_p7  ;;  %p1301_p6 = por %p1300_p4, %p1299_p2 }
  0x26   : > { %p1295_p0 = pneg %p1294_p13 }
  0x28   : > { %p1302_p8 = pnand %p1301_p6, %p1295_p0 }
  0x2a   : > { %1305 = shalt.err (!%p1302_p8)
}
  0x2b   : > { %s1563_s17 = smov 128   ;;  %s1564_s20 = smov 8  }
  0x2c   : > { %1196 = dma.hbm_to_vmem [thread:$0]  (!%p1661_p5), %s1988_s1, 2048, %s1651_s14, [#allocation6], %s1563_s17, %s1563_s17, %s1564_s20  }
  0x2d   : > { %s1306_s26 = scalar_lea.hbm %s1990_s3, 2048 }
  0x2e   : > { %p1307_p9 = scmp.ne.s32.totalorder %s1990_s3, %s1306_s26  ;;  %p1313_p12 = scmp.lt.u32.totalorder %s1306_s26, %s1990_s3 }
  0x30   : > { %p1309_p10 = pnand %p1307_p9, %p1677_p7 }
  0x32   : > { %p1310_p11 = pneg %p1309_p10 }
  0x34   : > { %p1315_p13 = pnand %p1313_p12, %p1310_p11 }
  0x36   : > { %1318 = shalt.err (!%p1315_p13)
}
  0x37   : > { %s1319_s14 = scalar_lea.vmem %s1665_s18, 2048  ;;  %p1327_p6 = scmp.lt.s32.totalorder %s1665_s18, %s1665_s18 }
  0x38   : > { %p1320_p0 = scmp.ne.s32.totalorder %s1665_s18, %s1319_s14  ;;  %p1328_p8 = scmp.lt.s32.totalorder %s1319_s14, %s1319_s14 }
  0x3a   : > { %p1322_p2 = pnand %p1320_p0, %p1677_p7  ;;  %p1329_p9 = por %p1328_p8, %p1327_p6 }
  0x3c   : > { %p1323_p4 = pneg %p1322_p2 }
  0x3e   : > { %p1330_p10 = pnand %p1329_p9, %p1323_p4 }
  0x40   : > { %1333 = shalt.err (!%p1330_p10)
}
  0x41   : > { %1202 = dma.hbm_to_vmem [thread:$0]  (!%p1661_p5), %s1990_s3, 2048, %s1665_s18, [#allocation9], %s1563_s17, %s1563_s17, %s1564_s20  }
  0x42   : > { %s1334_s25 = scalar_lea.hbm %s1989_s2, 16 }
  0x43   : > { %p1335_p11 = scmp.ne.s32.totalorder %s1989_s2, %s1334_s25  ;;  %p1341_p0 = scmp.lt.u32.totalorder %s1334_s25, %s1989_s2 }
  0x45   : > { %p1337_p12 = pnand %p1335_p11, %p1677_p7 }
  0x47   : > { %p1338_p13 = pneg %p1337_p12 }
  0x49   : > { %p1343_p2 = pnand %p1341_p0, %p1338_p13 }
  0x4b   : > { %1346 = shalt.err (!%p1343_p2)
}
  0x4c   : > { %s1347_s18 = scalar_lea.vmem %s1667_s21, 16  ;;  %s1354_s17 = scalar_lea.vmem %s1667_s21, 32 }
  0x4d   : > { %p1348_p4 = scmp.ne.s32.totalorder %s1667_s21, %s1347_s18  ;;  %p1355_p9 = scmp.lt.s32.totalorder %s1667_s21, %s1667_s21 }
  0x4e   : > { %p1356_p10 = scmp.lt.s32.totalorder %s1354_s17, %s1347_s18 }
  0x4f   : > { %p1350_p6 = pnand %p1348_p4, %p1677_p7 }
  0x50   : > { %p1357_p11 = por %p1356_p10, %p1355_p9 }
  0x51   : > { %p1351_p8 = pneg %p1350_p6 }
  0x53   : > { %p1358_p12 = pnand %p1357_p11, %p1351_p8 }
  0x55   : > { %1361 = shalt.err (!%p1358_p12)
}
  0x56   : > { %1199 = dma.hbm_to_vmem [thread:$0]  (!%p1661_p5), %s1989_s2, 16, %s1667_s21, [#allocation6]  }
  0x57   : > { %s1565_s8 = smov [#allocation10]   ;;  %s1566_s23 = smov [#allocation11]  }
  0x58   : > { %s317_s22 = sshll.u32 %s1565_s8, 4  ;;  %s327_s24 = sshll.u32 %s1566_s23, 4  ;;  %s318_s22 = int_to_ptr.vmem [resolvable:$true] %s317_s22  ;;  %s328_s24 = int_to_ptr.vmem [resolvable:$true] %s327_s24 }
  0x59   : > { %s1362_s28 = scalar_lea.hbm %s1991_s4, 16 }
  0x5a   : > { %p1363_p13 = scmp.ne.s32.totalorder %s1991_s4, %s1362_s28  ;;  %p1369_p4 = scmp.lt.u32.totalorder %s1362_s28, %s1991_s4 }
  0x5c   : > { %p1365_p0 = pnand %p1363_p13, %p1677_p7 }
  0x5e   : > { %p1366_p2 = pneg %p1365_p0 }
  0x60   : > { %p1371_p6 = pnand %p1369_p4, %p1366_p2 }
  0x62   : > { %1374 = shalt.err (!%p1371_p6)
}
  0x63   : > { %s1375_s21 = scalar_lea.vmem %s318_s22, 16  ;;  %s1382_s20 = scalar_lea.vmem %s318_s22, 32 }
  0x64   : > { %p1376_p8 = scmp.ne.s32.totalorder %s318_s22, %s1375_s21  ;;  %p1383_p11 = scmp.lt.s32.totalorder %s318_s22, %s318_s22 }
  0x65   : > { %p1384_p12 = scmp.lt.s32.totalorder %s1382_s20, %s1375_s21 }
  0x66   : > { %p1378_p9 = pnand %p1376_p8, %p1677_p7 }
  0x67   : > { %p1385_p1 = por %p1384_p12, %p1383_p11 }
  0x68   : > { %p1379_p10 = pneg %p1378_p9 }
  0x6a   : > { %p1386_p3 = pnand %p1385_p1, %p1379_p10 }
  0x6c   : > { %1389 = shalt.err (!%p1386_p3)
}
  0x6d   : > { %1205 = dma.hbm_to_vmem [thread:$0]  (!%p1661_p5), %s1991_s4, 16, %s318_s22, [#allocation9]  }
  0x6e   : > { %s1390_s26 = scalar_lea.hbm %s1992_s5, 4096 }
  0x6f   : > { %p1391_p13 = scmp.ne.s32.totalorder %s1992_s5, %s1390_s26  ;;  %p1397_p3 = scmp.lt.u32.totalorder %s1390_s26, %s1992_s5 }
  0x71   : > { %p1393_p0 = pnand %p1391_p13, %p1677_p7 }
  0x73   : > { %p1394_p1 = pneg %p1393_p0 }
  0x75   : > { %p1399_p2 = pnand %p1397_p3, %p1394_p1 }
  0x77   : > { %1402 = shalt.err (!%p1399_p2)
}
  0x78   : > { %s1403_s17 = scalar_lea.vmem %s328_s24, 4096  ;;  %p1411_p9 = scmp.lt.s32.totalorder %s328_s24, %s328_s24 }
  0x79   : > { %p1404_p4 = scmp.ne.s32.totalorder %s328_s24, %s1403_s17  ;;  %p1412_p10 = scmp.lt.s32.totalorder %s1403_s17, %s1403_s17 }
  0x7b   : > { %p1406_p6 = pnand %p1404_p4, %p1677_p7  ;;  %p1413_p11 = por %p1412_p10, %p1411_p9 }
  0x7d   : > { %p1407_p8 = pneg %p1406_p6 }
  0x7f   : > { %p1414_p12 = pnand %p1413_p11, %p1407_p8 }
  0x81   : > { %1417 = shalt.err (!%p1414_p12)
}
  0x82   : > { %s1567_s22 = smov 256   ;;  %s1568_s27 = smov 16  }
  0x83   : > { %1208 = dma.hbm_to_vmem [thread:$0]  (!%p1661_p5), %s1992_s5, 4096, %s328_s24, [#allocation12], %s1567_s22, %s1567_s22, %s1568_s27  }
  0x84   : > { %s953_s14 = sadd.s32 4294967294, %s1558_s12   ;;  %s1783_s8 = sadd.s32 1, %s1558_s12  }
  0x85   : > { %s39_s23 = sadd.s32 1, %s1554_s11  ;;  %s36_s25 = ssub.s32 %s1558_s12, %s1783_s8 }
  0x86   : > { %p46_p7 = scmp.ne.s32.totalorder %s1554_s11, %s1550_s10  ;;  %p37_p13 = scmp.eq.s32.totalorder %s36_s25, 0 }
  0x87   : > { %p47_p0 = scmp.eq.s32.totalorder %s1558_s12, 0  ;;  %p52_p1 = scmp.ne.s32.totalorder %s1550_s10, %s1546_s30 }
  0x88   : > { %p228_p3 = scmp.eq.s32.totalorder %s1646_s15, 2  ;;  %p2006_p4 = scmp.eq.s32.totalorder %s1646_s15, 0 }
  0x89   : > { %s1795_s26 = scalar_select %p37_p13, %s1554_s11, %s39_s23  }
  0x8a   : > { %p48_p2 = por %p47_p0, %p46_p7  ;;  %p1799_p6 = por %p2006_p4, %p52_p1 }
  0x8b   : > { %p1803_p5 = por %p228_p3, %p46_p7  ;;  %p234_p8 = scmp.eq.s32.totalorder %s953_s14, 2 }
  0x8c   : > { %p1225_p9 = scmp.lt.s32.totalorder %s1558_s12, 3  ;;  %s344_s28 = sand.u32 1, %s1554_s11  }
  0x8d   : > { %s2008_s24 = scalar_select %p1803_p5, 1, 0 }
  0x8e   : > { %p1809_p10 = por %p234_p8, %p52_p1  ;;  %s961_s13 = sshll.u32 %s344_s28, 3 }
  0x8f   : > { %s962_s18 = sshll.u32 %s1558_s12, 7  ;;  %s2010_s0 = sld [smem:[#allocation22_spill]] }
  0x90   : > { %s2009_s29 = scalar_select %p1809_p10, 1, 0 }
  0x91   : > { %s348_s21 = scalar_lea.vmem [#allocation2], %s961_s13  ;;  %p1819_p11 = pnand %p1225_p9, %p48_p2 }
  0x92   : > { %s355_s20 = sshll.u32 %s348_s21, 4  ;;  %s345_s23 = scalar_lea.sflag [#allocation3], %s344_s28  ;;  %s1823_s20 = int_to_ptr.vmem [resolvable:$true] %s355_s20 }
  0x93   : > { %p1420_p7 = pneg %p1819_p11 }
  0x95   : > { %s1817_s27 = scalar_lea.hbm %s2010_s0, %s962_s18  ;;  %s1423_s17 = scalar_lea.hbm %s2010_s0, 384 }
  0x96   : > { %s1418_s25 = scalar_lea.hbm %s1817_s27, 128  ;;  %p1424_p1 = scmp.lt.u32.totalorder %s1817_s27, %s2010_s0 }
  0x97   : > { %p1419_p12 = scmp.ne.s32.totalorder %s1817_s27, %s1418_s25  ;;  %p1425_p3 = scmp.lt.u32.totalorder %s1423_s17, %s1418_s25 }
  0x98   : > { %p1427_p4 = scmp.lt.u32.totalorder %s1418_s25, %s1817_s27 }
  0x99   : > { %p1421_p13 = pnand %p1420_p7, %p1419_p12  ;;  %p1426_p2 = por %p1425_p3, %p1424_p1 }
  0x9b   : > { %p1422_p0 = pneg %p1421_p13  ;;  %p1428_p8 = por %p1427_p4, %p1426_p2 }
  0x9d   : > { %p1429_p9 = pnand %p1428_p8, %p1422_p0 }
  0x9f   : > { %1432 = shalt.err (!%p1429_p9)
}
  0xa0   : > { %s1433_s28 = scalar_lea.vmem %s1823_s20, 128  ;;  %s1569_s18 = smov [#allocation2]  }
  0xa1   : > { %p1434_p12 = scmp.ne.s32.totalorder %s1823_s20, %s1433_s28  ;;  %s1438_s13 = sshll.u32 %s1569_s18, 4  ;;  %s1439_s13 = int_to_ptr.vmem [resolvable:$false] %s1438_s13 }
  0xa2   : > { %s1440_s22 = scalar_lea.vmem %s1439_s13, 256  ;;  %p1441_p5 = scmp.lt.s32.totalorder %s1823_s20, %s1439_s13 }
  0xa3   : > { %p1436_p13 = pnand %p1434_p12, %p1420_p7  ;;  %p1442_p1 = scmp.lt.s32.totalorder %s1440_s22, %s1433_s28 }
  0xa5   : > { %p1437_p10 = pneg %p1436_p13  ;;  %p1443_p3 = por %p1442_p1, %p1441_p5 }
  0xa7   : > { %p1444_p2 = pnand %p1443_p3, %p1437_p10 }
  0xa9   : > { %1447 = shalt.err (!%p1444_p2)
}
  0xaa   : > { %1212 = dma.hbm_to_vmem [thread:$0]  (!%p1819_p11), %s1817_s27, 128, %s1823_s20, %s345_s23  }
  0xab   : > { %p2012_p0 = scmp.ne.s32.totalorder %s2003_s16, 0 }
  0xac   : > { %s1853_s25 = sand.u32 (!%p2012_p0), 1, %s1550_s10  }
  0xad   : > { %371 = sbr.rel (%p2012_p0) target bundleno = 915 (0x393), region = 52  ;;  %s964_s17 = sshll.u32 (!%p2012_p0), %s1853_s25, 3 }
  0xae   : > { %s374_s21 = scalar_lea.sflag (!%p2012_p0), [#allocation3], %s1853_s25  ;;  %s1859_s28 = scalar_lea.vmem (!%p2012_p0), [#allocation2], %s964_s17 }
  0xb4   : > { %1521 = dma.done.wait (%p1799_p6), %s374_s21, 128  }
  0xb5   : > { %1523 = vsyncadd (%p1799_p6), %s374_s21, 4294967168  ;;  %p2013_p5 = scmp.eq.s32.totalorder %s1646_s15, 0 }
  0xb7   : > { %1525 = dma.done.wait (%p2013_p5), [#allocation6], 2064   ;;  %p2014_p10 = pmov %p2013_p5 }
  0xb8   : > { %p2015_p11 = pmov %p2013_p5 }
  0xb9   : > { %1527 = vsyncadd (%p2014_p10), [#allocation6], 4294965232 }
  0xba   : > { %1529 = dma.done.wait (%p2015_p11), [#allocation9], 2064   ;;  %p2016_p7 = pmov %p2013_p5 }
  0xbb   : > { %p2017_p4 = pmov %p2013_p5 }
  0xbc   : > { %1531 = vsyncadd (%p2016_p7), [#allocation9], 4294965232 }
  0xbd   : > { %1533 = dma.done.wait (%p2017_p4), [#allocation12], 4096   ;;  %p2018_p8 = pmov %p2017_p4 }
  0xbe   : > { %v1570_v0 = vmov 0.0|0.0   ;;  %vm1571_vm0 = vmmov 0   ;;  %v1572_v1 = vmov 0.0   ;;  %v446_v2 = vld [vmem:[#allocation5] sm:$0xff]  ;;  %v447_v3 = vld [vmem:[#allocation5 + $0x8] sm:$0xff]  ;;  %v448_v4 = vld [vmem:[#allocation5 + $0x10] sm:$0xff] }
  0xbf   : > { %1535 = vsyncadd (%p2018_p8), [#allocation12], 4294963200  ;;  %1087 = vmatprep.subr.bf16.mxu0 %v1570_v0  ;;  %1049 = vmatprep.mubr.msk.f32.mxu0 %vm1571_vm0, %v1572_v1  ;;  %v1088_v5 = vpack.c.bf16 %v447_v3, %v446_v2  ;;  %v449_v6 = vld [vmem:[#allocation5 + $0x18] sm:$0xff]  ;;  %v450_v8 = vld [vmem:[#allocation5 + $0x20] sm:$0xff]  ;;  %s971_s27 = sshll.u32 %s1853_s25, 4  ;;  %s982_s20 = sshll.u32 %s1646_s15, 8 }
  0xc0   : > { %1111 = vmatprep.subr.bf16.mxu1 %v1570_v0  ;;  %1084 = vmatprep.mubr.msk.f32.mxu1 %vm1571_vm0, %v1572_v1  ;;  %v1091_v7 = vpack.c.bf16 %v449_v6, %v448_v4  ;;  %v451_v9 = vld [vmem:[#allocation5 + $0x28] sm:$0xff]  ;;  %v542_v12 = vld [vmem:[#allocation8 + $0x10] sm:$0xff]  ;;  %v543_v13 = vld [vmem:[#allocation8 + $0x18] sm:$0xff]  ;;  %s440_s14 = scalar_lea.vmem [#allocation14], %s971_s27  ;;  %p441_p6 = scmp.lt.s32.totalorder %s1646_s15, 2 }
  0xc1   : > { %1089 = vmatpush3.bf16.msra.mxu0 %v1088_v5  ;;  %v540_v10 = vld [vmem:[#allocation8] sm:$0xff]  ;;  %v541_v11 = vld [vmem:[#allocation8 + $0x8] sm:$0xff]  ;;  %v1094_v14 = vpack.c.bf16 %v451_v9, %v450_v8  ;;  %v453_v17 = vld [vmem:[#allocation5 + $0x38] sm:$0xff]  ;;  %v1115_v18 = vpack.c.bf16 %v543_v13, %v542_v12  ;;  %s791_s23 = sshll.u32 %s440_s14, 4  ;;  %s1906_s22 = scalar_lea.hbm %s1996_s9, %s982_s20  ;;  %s1908_s23 = int_to_ptr.vmem [resolvable:$true] %s791_s23 }
  0xc2   : > { %1090 = vmatprep.subr.bf16.mxu0 %v1570_v0  ;;  %v1112_v15 = vpack.c.bf16 %v541_v11, %v540_v10  ;;  %v452_v16 = vld [vmem:[#allocation5 + $0x30] sm:$0xff]  ;;  %v544_v19 = vld [vmem:[#allocation8 + $0x20] sm:$0xff]  ;;  %v547_v26 = vld [vmem:[#allocation8 + $0x38] sm:$0xff]  ;;  %s764_s21 = scalar_lea.sflag [#allocation15], %s1853_s25  ;;  %p2019_p12 = scmp.ne.s32.totalorder %s2008_s24, 0 }
  0xc3   : > { %v545_v20 = vld [vmem:[#allocation8 + $0x28] sm:$0xff]  ;;  %v1097_v21 = vpack.c.bf16 %v453_v17, %v452_v16  ;;  %v454_v22 = vld [vmem:[#allocation5 + $0x40] sm:$0xff]  ;;  %v546_v25 = vld [vmem:[#allocation8 + $0x30] sm:$0xff]  ;;  %s1573_s16 = smov [#allocation14]  }
  0xc4   : > { %1113 = vmatpush3.bf16.msra.mxu1 %v1112_v15  ;;  %v455_v23 = vld [vmem:[#allocation5 + $0x48] sm:$0xff]  ;;  %v1118_v24 = vpack.c.bf16 %v545_v20, %v544_v19  ;;  %v456_v28 = vld [vmem:[#allocation5 + $0x50] sm:$0xff]  ;;  %v457_v29 = vld [vmem:[#allocation5 + $0x58] sm:$0xff]  ;;  %v1121_v30 = vpack.c.bf16 %v547_v26, %v546_v25  ;;  %s1452_s19 = sshll.u32 %s1573_s16, 4  ;;  %s1453_s19 = int_to_ptr.vmem [resolvable:$false] %s1452_s19 }
  0xc5   : > { %1092 = vmatpush3.bf16.msra.mxu0 %v1091_v7  ;;  %1114 = vmatprep.subr.bf16.mxu1 %v1570_v0  ;;  %v1100_v27 = vpack.c.bf16 %v455_v23, %v454_v22  ;;  %v548_v31 = vld [vmem:[#allocation8 + $0x40] sm:$0xff]  ;;  %v549_v32 = vld [vmem:[#allocation8 + $0x48] sm:$0xff]  ;;  %v1103_v33 = vpack.c.bf16 %v457_v29, %v456_v28  ;;  %v550_v37 = vld [vmem:[#allocation8 + $0x50] sm:$0xff]  ;;  %s1454_s27 = scalar_lea.vmem %s1453_s19, 512  ;;  %p1455_p3 = scmp.lt.s32.totalorder %s1908_s23, %s1453_s19 }
  0xc6   : > { %1093 = vmatprep.subr.bf16.mxu0 %v1570_v0  ;;  %v458_v34 = vld [vmem:[#allocation5 + $0x60] sm:$0xff]  ;;  %v459_v35 = vld [vmem:[#allocation5 + $0x68] sm:$0xff]  ;;  %v1124_v36 = vpack.c.bf16 %v549_v32, %v548_v31  ;;  %v460_v40 = vld [vmem:[#allocation5 + $0x70] sm:$0xff] }
  0xc7   : > { %v551_v38 = vld [vmem:[#allocation8 + $0x58] sm:$0xff]  ;;  %v1106_v39 = vpack.c.bf16 %v459_v35, %v458_v34  ;;  %v552_v43 = vld [vmem:[#allocation8 + $0x60] sm:$0xff]  ;;  %v553_v44 = vld [vmem:[#allocation8 + $0x68] sm:$0xff] }
  0xc8   : > { %1116 = vmatpush3.bf16.msra.mxu1 %v1115_v18  ;;  %v461_v41 = vld [vmem:[#allocation5 + $0x78] sm:$0xff]  ;;  %v1127_v42 = vpack.c.bf16 %v551_v38, %v550_v37  ;;  %v1130_v46 = vpack.c.bf16 %v553_v44, %v552_v43  ;;  %v635_v51 = vld [vmem:[#allocation11 + $0x8] sm:$0xff]  ;;  %v634_v53 = vld [vmem:[#allocation11] sm:$0xff] }
  0xc9   : > { %1095 = vmatpush3.bf16.msra.mxu0 %v1094_v14  ;;  %1117 = vmatprep.subr.bf16.mxu1 %v1570_v0  ;;  %v1109_v45 = vpack.c.bf16 %v461_v41, %v460_v40  ;;  %v445_v47 = vld [vmem:[%s1859_s28] sm:$0xff]  ;;  %v638_v60 = vld [vmem:[#allocation11 + $0x20] sm:$0xff]  ;;  %v973_v29 = vld [vmem:[#allocation7] ss:$0 sm:$0xff]  ;;  %s1448_s28 = scalar_lea.vmem %s1908_s23, 256 }
  0xca   : > { %1096 = vmatprep.subr.bf16.mxu0 %v1570_v0  ;;  %v554_v48 = vld [vmem:[#allocation8 + $0x70] sm:$0xff]  ;;  %v555_v49 = vld [vmem:[#allocation8 + $0x78] sm:$0xff]  ;;  %v642_v2 = vld [vmem:[#allocation11 + $0x40] sm:$0xff]  ;;  %p1449_p9 = scmp.ne.s32.totalorder %s1908_s23, %s1448_s28  ;;  %p1456_p2 = scmp.lt.s32.totalorder %s1454_s27, %s1448_s28 }
  0xcb   : > { %v1133_v50 = vpack.c.bf16 %v555_v49, %v554_v48  ;;  %v637_v52 = vld [vmem:[#allocation11 + $0x18] sm:$0xff]  ;;  %v636_v55 = vld [vmem:[#allocation11 + $0x10] sm:$0xff]  ;;  %v639_v56 = vld [vmem:[#allocation11 + $0x28] sm:$0xff] }
  0xcc   : > { %1119 = vmatpush3.bf16.msra.mxu1 %v1118_v24  ;;  %v1135_v54 = vpack.c.bf16 %v637_v52, %v635_v51  ;;  %v641_v57 = vld [vmem:[#allocation11 + $0x38] sm:$0xff]  ;;  %v1137_v58 = vpack.c.bf16 %v636_v55, %v634_v53  ;;  %v640_v61 = vld [vmem:[#allocation11 + $0x30] sm:$0xff]  ;;  %v643_v62 = vld [vmem:[#allocation11 + $0x48] sm:$0xff]  ;;  %p1450_p13 = pnand %p1449_p9, %p2019_p12  ;;  %p1457_p0 = por %p1456_p2, %p1455_p3 }
  0xcd   : > { %1098 = vmatpush3.bf16.msra.mxu0 %v1097_v21  ;;  %1120 = vmatprep.subr.bf16.mxu1 %v1570_v0  ;;  %v1139_v59 = vpack.c.bf16 %v641_v57, %v639_v56  ;;  %v645_v63 = vld [vmem:[#allocation11 + $0x58] sm:$0xff]  ;;  %v644_v3 = vld [vmem:[#allocation11 + $0x50] sm:$0xff]  ;;  %v647_v4 = vld [vmem:[#allocation11 + $0x68] sm:$0xff] }
  0xce   : > { %1099 = vmatprep.subr.bf16.mxu0 %v1570_v0  ;;  %v649_v5 = vld [vmem:[#allocation11 + $0x78] sm:$0xff]  ;;  %v1145_v6 = vpack.c.bf16 %v644_v3, %v642_v2  ;;  %v646_v8 = vld [vmem:[#allocation11 + $0x60] sm:$0xff]  ;;  %v648_v9 = vld [vmem:[#allocation11 + $0x70] sm:$0xff]  ;;  %p1451_p1 = pneg %p1450_p13 }
  0xcf   : > { %v1147_v7 = vpack.c.bf16 %v649_v5, %v647_v4  ;;  %v651_v10 = vld [vmem:[#allocation11 + $0x88] sm:$0xff]  ;;  %v653_v11 = vld [vmem:[#allocation11 + $0x98] sm:$0xff]  ;;  %v1149_v12 = vpack.c.bf16 %v648_v9, %v646_v8  ;;  %v650_v14 = vld [vmem:[#allocation11 + $0x80] sm:$0xff] }
  0xd0   : > { %1122 = vmatpush3.bf16.msra.mxu1 %v1121_v30  ;;  %v1151_v13 = vpack.c.bf16 %v653_v11, %v651_v10  ;;  %v652_v15 = vld [vmem:[#allocation11 + $0x90] sm:$0xff]  ;;  %v655_v16 = vld [vmem:[#allocation11 + $0xa8] sm:$0xff]  ;;  %v657_v17 = vld [vmem:[#allocation11 + $0xb8] sm:$0xff]  ;;  %p1458_p5 = pnand %p1457_p0, %p1451_p1 }
  0xd1   : > { %1101 = vmatpush3.bf16.msra.mxu0 %v1100_v27  ;;  %1123 = vmatprep.subr.bf16.mxu1 %v1570_v0  ;;  %v1153_v18 = vpack.c.bf16 %v652_v15, %v650_v14  ;;  %v1155_v19 = vpack.c.bf16 %v657_v17, %v655_v16  ;;  %v654_v20 = vld [vmem:[#allocation11 + $0xa0] sm:$0xff]  ;;  %v656_v21 = vld [vmem:[#allocation11 + $0xb0] sm:$0xff]  ;;  %v659_v22 = vld [vmem:[#allocation11 + $0xc8] sm:$0xff] }
  0xd2   : > { %1102 = vmatprep.subr.bf16.mxu0 %v1570_v0  ;;  %v661_v23 = vld [vmem:[#allocation11 + $0xd8] sm:$0xff]  ;;  %v1157_v24 = vpack.c.bf16 %v656_v21, %v654_v20  ;;  %v658_v26 = vld [vmem:[#allocation11 + $0xc0] sm:$0xff]  ;;  %v660_v27 = vld [vmem:[#allocation11 + $0xd0] sm:$0xff] }
  0xd3   : > { %v1159_v25 = vpack.c.bf16 %v661_v23, %v659_v22  ;;  %v1161_v28 = vpack.c.bf16 %v660_v27, %v658_v26  ;;  %v663_v34 = vld [vmem:[#allocation11 + $0xe8] sm:$0xff]  ;;  %v665_v35 = vld [vmem:[#allocation11 + $0xf8] sm:$0xff]  ;;  %v662_v37 = vld [vmem:[#allocation11 + $0xe0] sm:$0xff] }
  0xd4   : > { %1125 = vmatpush3.bf16.msra.mxu1 %v1124_v36  ;;  %v1163_v36 = vpack.c.bf16 %v665_v35, %v663_v34  ;;  %v664_v38 = vld [vmem:[#allocation11 + $0xf0] sm:$0xff]  ;;  %v974_v40 = vld [vmem:[#allocation10] ss:$0 sm:$0xff]  ;;  %v666_v48 = vld [vmem:[%s1993_s6] sm:$0x3] }
  0xd5   : > { %1104 = vmatpush3.bf16.msra.mxu0 %v1103_v33  ;;  %1126 = vmatprep.subr.bf16.mxu1 %v1570_v0 }
  0xd6   : > { %1105 = vmatprep.subr.bf16.mxu0 %v1570_v0 }
  0xd8   : > { %1128 = vmatpush3.bf16.msra.mxu1 %v1127_v42 }
  0xd9   : > { %1107 = vmatpush3.bf16.msra.mxu0 %v1106_v39  ;;  %1129 = vmatprep.subr.bf16.mxu1 %v1570_v0  ;;  %v1165_v39 = vpack.c.bf16 %v664_v38, %v662_v37 }
  0xda   : > { %1108 = vmatprep.subr.bf16.mxu0 %v1570_v0 }
  0xdc   : > { %1131 = vmatpush3.bf16.msra.mxu1 %v1130_v46 }
  0xdd   : > { %1110 = vmatpush3.bf16.msra.mxu0 %v1109_v45  ;;  %1132 = vmatprep.subr.bf16.mxu1 %v1570_v0  ;;  %v1141_v0 = vpack.c.bf16 %v640_v61, %v638_v60  ;;  %v668_v45 = vlaneseq }
  0xde   : > { %1136 = vmatprep.subr.bf16.mxu0 %v1135_v54 }
  0xdf   : > { %v669_v46 = vshrl.u32 %v668_v45, 7 }
  0xe0   : > { %1050 = vmatmul.mubr.f32.vlgmr.msra.gmra.mrb[0].mxu0 %v445_v47  ;;  %1134 = vmatpush3.bf16.msra.mxu1 %v1133_v50 }
  0xe1   : > { %742 = vmatprep.mubr.f32.mxu0 %v1572_v1  ;;  %1138 = vmatpush1.bf16.msra.mxu0 %v1137_v58  ;;  %v1143_v1 = vpack.c.bf16 %v645_v63, %v643_v62  ;;  %v670_v47 = vsub.s32 0, %v669_v46  ;;  %v674_v49 = vsub.s32 1, %v669_v46 }
  0xe2   : > { %1140 = vmatprep.subr.bf16.mxu0 %v1139_v59 }
  0xe3   : > { %v671_v50 = vrot.slane %v666_v48, %v670_v47  ;;  %v675_v51 = vrot.slane %v666_v48, %v674_v49 }
  0xe5   : > { %1142 = vmatpush1.bf16.msra.mxu0 %v1141_v0 }
  0xe6   : > { %1144 = vmatprep.subr.bf16.mxu0 %v1143_v1 }
  0xe9   : > { %1146 = vmatpush1.bf16.msra.mxu0 %v1145_v6 }
  0xea   : > { %1148 = vmatprep.subr.bf16.mxu0 %v1147_v7 }
  0xed   : > { %1150 = vmatpush1.bf16.msra.mxu0 %v1149_v12 }
  0xee   : > { %1152 = vmatprep.subr.bf16.mxu0 %v1151_v13 }
  0xf1   : > { %1154 = vmatpush1.bf16.msra.mxu0 %v1153_v18 }
  0xf2   : > { %1156 = vmatprep.subr.bf16.mxu0 %v1155_v19 }
  0xf5   : > { %1158 = vmatpush1.bf16.msra.mxu0 %v1157_v24 }
  0xf6   : > { %1160 = vmatprep.subr.bf16.mxu0 %v1159_v25 }
  0xf9   : > { %1162 = vmatpush1.bf16.msra.mxu0 %v1161_v28 }
  0xfa   : > { %1164 = vmatprep.subr.bf16.mxu0 %v1163_v36 }
  0xfd   : > { %1166 = vmatpush1.bf16.msra.mxu0 %v1165_v39 }
 0x1b3   : > { %v535_v30 = vpop.f32.mrb[0].mxu0 }
 0x1b4   : > { %v536_v31 = vadd.f32 %v973_v29, %v535_v30  ;;  %v1051_v32 = vpop.f32.mrb[1].mxu0 }
 0x1b6   : > { %v539_v33 = vmax.f32 %v536_v31, 0.0 }
 0x1b8   : > { %1085 = vmatmul.mubr.f32.vlgmr.msra.gmra.mrb[0].mxu1 %v539_v33 }
 0x28b   : > { %v629_v41 = vpop.f32.mrb[0].mxu1 }
 0x28c   : > { %v630_v42 = vadd.f32 %v974_v40, %v629_v41  ;;  %v1086_v43 = vpop.f32.mrb[1].mxu1 }
 0x28e   : > { %v633_v44 = vmax.f32 %v630_v42, 0.0 }
 0x290   : > { %743 = vmatmul.mubr.f32.vlgmr.msra.gmra.mrb[2].mxu0 %v633_v44 }
 0x363   : > { %v744_v52 = vpop.f32.mrb[2].mxu0 }
 0x364   : > { %v745_v53 = vadd.f32 %v744_v52, %v671_v50  ;;  %v746_v54 = vpop.f32.mrb[3].mxu0 }
 0x365   : > { %v747_v55 = vadd.f32 %v746_v54, %v675_v51 }
 0x366   : > { %755 = vst [vmem:[%s440_s14] sm:$0xff] %v745_v53 }
 0x367   : > { %v749_v56 = vmul.f32 0.5, %v747_v55  ;;  %756 = vst [vmem:[%s440_s14 + $0x8] sm:$0xff] %v747_v55 }
 0x368   : > { %1461 = shalt.err (!%p1458_p5)
}
 0x369   : > { %s1462_s20 = scalar_lea.hbm %s1906_s22, 256  ;;  %s1466_s13 = scalar_lea.hbm %s1996_s9, 768 }
 0x36a   : > { %p1463_p10 = scmp.ne.s32.totalorder %s1906_s22, %s1462_s20  ;;  %p1467_p4 = scmp.lt.u32.totalorder %s1906_s22, %s1996_s9 }
 0x36b   : > { %p1468_p8 = scmp.lt.u32.totalorder %s1466_s13, %s1462_s20  ;;  %p1470_p13 = scmp.lt.u32.totalorder %s1462_s20, %s1906_s22 }
 0x36c   : > { %p1464_p11 = pnand %p1463_p10, %p2019_p12 }
 0x36d   : > { %p1469_p9 = por %p1468_p8, %p1467_p4 }
 0x36e   : > { %p1465_p7 = pneg %p1464_p11 }
 0x36f   : > { %p1471_p1 = por %p1470_p13, %p1469_p9 }
 0x371   : > { %p1472_p3 = pnand %p1471_p1, %p1465_p7 }
 0x373   : > { %1475 = shalt.err (!%p1472_p3)
}
 0x374   : > { %1190 = dma.vmem_to_hbm [thread:$0]  (%p2019_p12), %s1908_s23, 256, %s1906_s22, %s764_s21   ;;  %v750_v57 = vmul.f32 1.442695, %v749_v56 }
 0x375   : > { %s442_s28 = scalar_select %p441_p6, %s1646_s15, 2 }
 0x376   : > { %1276 = vpow2.f32 %v750_v57  ;;  %s977_s13 = sshll.u32 %s1646_s15, 7  ;;  %s433_s16 = scalar_lea.vmem [#allocation13], %s964_s17 }
 0x377   : > { %s972_s27 = sshll.u32 %s442_s28, 3  ;;  %s777_s19 = sshll.u32 %s433_s16, 4  ;;  %s1946_s19 = int_to_ptr.vmem [resolvable:$true] %s777_s19 }
 0x378   : > { %s444_s18 = scalar_lea.vmem %s1994_s7, %s972_s27  ;;  %s2020_s21 = sld [smem:[#allocation23_spill]] }
 0x379   : > { %v752_v58 = vld [vmem:[%s444_s18] sm:$0xff]  ;;  %s759_s28 = scalar_lea.sflag [#allocation4], %s1853_s25  ;;  %s1476_s27 = scalar_lea.vmem %s1946_s19, 128 }
 0x37a   : > { %p1477_p6 = scmp.ne.s32.totalorder %s1946_s19, %s1476_s27  ;;  %s1574_s15 = smov [#allocation13]  }
 0x37b   : > { %s1480_s17 = sshll.u32 %s1574_s15, 4  ;;  %s1481_s17 = int_to_ptr.vmem [resolvable:$false] %s1480_s17 }
 0x37c   : > { %p1478_p2 = pnand %p1477_p6, %p2019_p12  ;;  %s1482_s20 = scalar_lea.vmem %s1481_s17, 256 }
 0x37d   : > { %p1483_p5 = scmp.lt.s32.totalorder %s1946_s19, %s1481_s17  ;;  %p1484_p10 = scmp.lt.s32.totalorder %s1482_s20, %s1476_s27 }
 0x37e   : > { %s1944_s0 = scalar_lea.hbm %s2020_s21, %s977_s13  ;;  %p1479_p0 = pneg %p1478_p2 }
 0x37f   : > { %p1485_p11 = por %p1484_p10, %p1483_p5 }
 0x380   : > { %v1277_v59 = vpop.eup %1276 }
 0x381   : > { %v753_v60 = vmul.f32 %v1277_v59, %v752_v58  ;;  %p1486_p7 = pnand %p1485_p11, %p1479_p0 }
 0x383   : > { %v754_v61 = vadd.f32 %v753_v60, %v745_v53 }
 0x385   : > { %757 = vst [vmem:[%s433_s16] sm:$0xff] %v754_v61 }
 0x386   : > { %1489 = shalt.err (!%p1486_p7)
}
 0x387   : > { %s1490_s25 = scalar_lea.hbm %s1944_s0, 128  ;;  %s1494_s13 = scalar_lea.hbm %s2020_s21, 384 }
 0x388   : > { %p1491_p4 = scmp.ne.s32.totalorder %s1944_s0, %s1490_s25  ;;  %p1495_p13 = scmp.lt.u32.totalorder %s1944_s0, %s2020_s21 }
 0x389   : > { %p1496_p1 = scmp.lt.u32.totalorder %s1494_s13, %s1490_s25  ;;  %p1498_p6 = scmp.lt.u32.totalorder %s1490_s25, %s1944_s0 }
 0x38a   : > { %p1492_p8 = pnand %p1491_p4, %p2019_p12 }
 0x38b   : > { %p1497_p3 = por %p1496_p1, %p1495_p13 }
 0x38c   : > { %p1493_p9 = pneg %p1492_p8 }
 0x38d   : > { %p1499_p2 = por %p1498_p6, %p1497_p3 }
 0x38f   : > { %p1500_p0 = pnand %p1499_p2, %p1493_p9 }
 0x391   : > { %1503 = shalt.err (!%p1500_p0)
}
 0x392   : > { %1189 = dma.vmem_to_hbm [thread:$0]  (%p2019_p12), %s1946_s19, 128, %s1944_s0, %s759_s28  }
 0x393 PF: > { %p1231_p5 = scmp.ge.s32.totalorder %s1558_s12, 2  ;;  %s803_s22 = sand.u32 1, %s1546_s30  }
 0x394   : > { %p2021_p10 = scmp.ne.s32.totalorder %s2009_s29, 0  ;;  %s804_s27 = scalar_lea.sflag [#allocation4], %s803_s22 }
 0x396   : > { %p1214_p11 = pnand %p1231_p5, %p2021_p10 }
 0x398   : > { %1537 = dma.done.wait (!%p1214_p11), %s804_s27, 128  }
 0x399   : > { %1539 = vsyncadd (!%p1214_p11), %s804_s27, 4294967168  ;;  %s813_s15 = scalar_lea.sflag [#allocation15], %s803_s22 }
 0x39a   : > { %1541 = dma.done.wait (!%p1214_p11), %s813_s15, 256  }
 0x39b   : > { %1543 = vsyncadd (!%p1214_p11), %s813_s15, 4294967040  ;;  %p29_p12 = scmp.ge.s32.totalorder %s1783_s8, 5   ;;  %s2022_s30 = smov %s1550_s10 }
 0x39c   : > { %s2023_s10 = smov %s1554_s11  ;;  %s2024_s11 = smov %s1795_s26 }
 0x39d   : > { %s2025_s12 = smov %s1783_s8  ;;  %31 = sbr.rel (!%p29_p12) target bundleno = 13 (0xd), region = 137 }
 0x3a4   :  { %818 = vsyncpa [#allocation3], 1 }
 0x3a5   :  { %820 = vsyncpa [#allocation3 + $0x1], 1 }
 0x3a6   :  { %821 = vsyncpa [#allocation6], 1 }
 0x3a7   :  { %822 = vsyncpa [#allocation9], 1 }
 0x3a8   :  { %823 = vsyncpa [#allocation12], 1 }
 0x3a9   :  { %824 = vsyncpa [#allocation4], 1 }
 0x3aa   :  { %826 = vsyncpa [#allocation4 + $0x1], 1 }
 0x3ab   :  { %827 = vsyncpa [#allocation15], 1 }
 0x3ac   :  { %829 = vsyncpa [#allocation15 + $0x1], 1 }

</bundles_post_ra>
